<compile_context>
chip_gen: v7x
topology: tpu7x:2x2x1
jax: 0.10.0
libtpu: 0.0.40
codegen_flags: <defaults>
</compile_context>

<pallas_src>
import functools

import jax
import jax.numpy as jnp
from jax.experimental import pallas as pl
from jax.experimental.pallas import tpu as pltpu


def _convblock_kernel(patches_ref, w_ref, o_ref, sum_ref, ssq_ref, *, use_act):
    # patches_ref: (1, CKp, HW_T) bf16      w_ref: (Coutp, CKp) bf16
    # o_ref:       (1, Coutp, HW) f32  -- block index depends only on n, so it is
    #                                     VMEM-resident across the HW-tile axis.
    # sum_ref/ssq_ref: (Coutp, 1) f32 scratch accumulators.
    t = pl.program_id(1)
    n_t = pl.num_programs(1)

    @pl.when(t == 0)
    def _init():
        sum_ref[...] = jnp.zeros_like(sum_ref)
        ssq_ref[...] = jnp.zeros_like(ssq_ref)

    # Conv tile as an MXU matmul: bf16 operands, f32 accumulation.
    y = jnp.dot(w_ref[...], patches_ref[0],
                preferred_element_type=jnp.float32)          # (Coutp, HW_T)

    # One-pass InstanceNorm statistics (sum and sum of squares per channel).
    sum_ref[...] += jnp.sum(y, axis=1, keepdims=True)
    ssq_ref[...] += jnp.sum(y * y, axis=1, keepdims=True)

    hw_t = y.shape[-1]
    off = pl.multiple_of(t * hw_t, 128)
    o_ref[0, :, pl.ds(off, hw_t)] = y                        # stage un-normalized tile

    @pl.when(t == n_t - 1)
    def _finalize():
        hw_total = o_ref.shape[-1]
        inv_hw = 1.0 / float(hw_total)
        mean = sum_ref[...] * inv_hw                          # (Coutp, 1)
        var = jnp.maximum(ssq_ref[...] * inv_hw - mean * mean, 0.0)
        scale = jax.lax.rsqrt(var + 1e-5)                     # (Coutp, 1)

        def body(i, carry):
            o2 = pl.multiple_of(i * hw_t, 128)
            blk = o_ref[0, :, pl.ds(o2, hw_t)]
            blk = (blk - mean) * scale
            if use_act:
                blk = jnp.maximum(blk, 0.0)
            o_ref[0, :, pl.ds(o2, hw_t)] = blk
            return carry

        jax.lax.fori_loop(0, n_t, body, 0)


def _ceil_to(v, m):
    return (v + m - 1) // m * m


def _pick_hw_tile(hw, max_tile=1024):
    if hw % 128 != 0:
        return hw  # fall back to a single full-extent tile
    cand = min(max_tile, hw)
    cand -= cand % 128
    while cand >= 128:
        if hw % cand == 0:
            return cand
        cand -= 128
    return hw


def conv_block_pallas(x_nchw, weight, bias=None, *, stride=1, padding=1,
                      use_act=True, hw_tile=None):
    """ConvBlock forward (down=True): reflect-pad Conv2d -> InstanceNorm2d -> ReLU.

    x_nchw : (N, Cin, H, W) float32
    weight : (Cout, Cin, KH, KW) float32 (PyTorch layout)
    bias   : ignored -- InstanceNorm2d(affine=False) cancels a per-channel bias.
    """
    del bias  # mathematically a no-op under InstanceNorm (affine=False)

    N, Cin, H, W = x_nchw.shape
    Cout, _, KH, KW = weight.shape

    # Reflect padding (padding_mode='reflect') stays in the XLA wrapper.
    xp = jnp.pad(x_nchw, ((0, 0), (0, 0), (padding, padding), (padding, padding)),
                 mode="reflect")

    Ho = (H + 2 * padding - KH) // stride + 1
    Wo = (W + 2 * padding - KW) // stride + 1
    HW = Ho * Wo
    KK = KH * KW
    CK = Cin * KK

    # Patches directly in (N, CK, HW) layout; feature order (c, kh, kw) matches
    # weight.reshape(Cout, Cin*KH*KW).  Only adjacent-axis merges -> no big transpose.
    slabs = []
    for kh in range(KH):
        for kw in range(KW):
            slabs.append(xp[:, :, kh:kh + stride * Ho:stride,
                            kw:kw + stride * Wo:stride])       # (N, Cin, Ho, Wo)
    patches = jnp.stack(slabs, axis=2).reshape(N, CK, HW)

    # MXU / vreg alignment padding (zeros are numerically inert).
    CKp = _ceil_to(CK, 16)
    Coutp = _ceil_to(Cout, 16)
    patches = jnp.pad(patches, ((0, 0), (0, CKp - CK), (0, 0))).astype(jnp.bfloat16)
    w2 = jnp.pad(weight.reshape(Cout, CK),
                 ((0, Coutp - Cout), (0, CKp - CK))).astype(jnp.bfloat16)

    if hw_tile is None:
        hw_tile = _pick_hw_tile(HW)
    assert HW % hw_tile == 0, (HW, hw_tile)
    n_hw_tiles = HW // hw_tile

    kernel = functools.partial(_convblock_kernel, use_act=use_act)

    out = pl.pallas_call(
        kernel,
        out_shape=jax.ShapeDtypeStruct((N, Coutp, HW), jnp.float32),
        grid_spec=pltpu.PrefetchScalarGridSpec(
            num_scalar_prefetch=0,
            grid=(N, n_hw_tiles),
            in_specs=[
                pl.BlockSpec((1, CKp, hw_tile), lambda n, t: (n, 0, t)),
                pl.BlockSpec((Coutp, CKp), lambda n, t: (0, 0)),
            ],
            out_specs=pl.BlockSpec((1, Coutp, HW), lambda n, t: (n, 0, 0)),
            scratch_shapes=[
                pltpu.VMEM((Coutp, 1), jnp.float32),   # per-channel sum
                pltpu.VMEM((Coutp, 1), jnp.float32),   # per-channel sum of squares
            ],
        ),
        compiler_params=pltpu.CompilerParams(
            dimension_semantics=("parallel", "arbitrary"),
            vmem_limit_bytes=48 * 1024 * 1024,   # fits v7x's 64 MiB VMEM with headroom
        ),
    )(patches, w2)

    # (N, Coutp, HW) -> (N, Cout, Ho, Wo): slice + reshape only, zero transposes.
    return out[:, :Cout, :].reshape(N, Cout, Ho, Wo)


def _reference(x, weight, bias, stride, padding, use_act=True):
    """Pure-JAX f32 reference matching the PyTorch ConvBlock forward."""
    xp = jnp.pad(x, ((0, 0), (0, 0), (padding, padding), (padding, padding)),
                 mode="reflect")
    y = jax.lax.conv_general_dilated(
        xp, weight, window_strides=(stride, stride), padding="VALID",
        dimension_numbers=("NCHW", "OIHW", "NCHW"))
    y = y + bias[None, :, None, None]
    mean = jnp.mean(y, axis=(2, 3), keepdims=True)
    var = jnp.var(y, axis=(2, 3), keepdims=True)       # biased, like InstanceNorm2d
    y = (y - mean) * jax.lax.rsqrt(var + 1e-5)
    return jnp.maximum(y, 0.0) if use_act else y


if __name__ == "__main__":
    # ConvBlock(4, 8, down=True, use_act=True, kernel_size=3, stride=1, padding=1)
    N, Cin, H, W = 2, 4, 16, 16
    Cout, K = 8, 3

    key = jax.random.PRNGKey(0)
    kx, kw, kb = jax.random.split(key, 3)
    x = jax.random.normal(kx, (N, Cin, H, W), dtype=jnp.float32)
    weight = jax.random.normal(kw, (Cout, Cin, K, K), dtype=jnp.float32) * 0.1
    bias = jax.random.normal(kb, (Cout,), dtype=jnp.float32) * 0.1

    fwd = jax.jit(functools.partial(conv_block_pallas, stride=1, padding=1,
                                    use_act=True, hw_tile=128))
    y = jax.block_until_ready(fwd(x, weight, bias))

    assert y.shape == (N, Cout, H, W), y.shape
    assert bool(jnp.all(y >= 0.0))  # ReLU applied

    y_ref = _reference(x, weight, bias, 1, 1)
    max_err = float(jnp.max(jnp.abs(y - y_ref)))
    assert max_err < 5e-2, f"max abs error {max_err}"

    print("KERNEL_OK")
</pallas_src>

<mosaic_0001>
module attributes {stable_mosaic.version = 11 : i64} {
  func.func @_convblock_kernel(%arg0: i32, %arg1: i32, %arg2: memref<1x48x128xbf16, #tpu.memory_space<vmem>>, %arg3: memref<16x48xbf16, #tpu.memory_space<vmem>>, %arg4: memref<1x16x256xf32, #tpu.memory_space<vmem>>, %arg5: memref<16x1xf32, #tpu.memory_space<vmem>>, %arg6: memref<16x1xf32, #tpu.memory_space<vmem>>) attributes {dimension_semantics = [#tpu.dimension_semantics<parallel>, #tpu.dimension_semantics<arbitrary>], iteration_bounds = array<i64: 2, 2>, scalar_prefetch = 0 : i64, scratch_operands = 2 : i64, tpu.core_type = #tpu.core_type<tc>, window_params = [{transform_indices = @transform_0, window_bounds = array<i64: 1, 48, 128>}, {pipeline_mode = #tpu.pipeline_mode<synchronous>, transform_indices = @transform_1, window_bounds = array<i64: 16, 48>}, {transform_indices = @transform_2, window_bounds = array<i64: 1, 16, 256>}]} {
    %c0_i32 = arith.constant 0 : i32
    %0 = arith.cmpi eq, %arg1, %c0_i32 : i32
    %1 = arith.extui %0 : i1 to i32
    %c0_i32_0 = arith.constant 0 : i32
    %2 = arith.cmpi ne, %1, %c0_i32_0 : i32
    scf.if %2 {
      %cst_18 = arith.constant 0.000000e+00 : f32
      %27 = vector.broadcast %cst_18 : f32 to vector<16x1xf32>
      %c0_19 = arith.constant 0 : index
      %c0_20 = arith.constant 0 : index
      %28 = vector.load %arg5[%c0_19, %c0_20] : memref<16x1xf32, #tpu.memory_space<vmem>>, vector<16x1xf32>
      tpu.vector_store %arg5[%c0_19, %c0_20], %27 {strides = array<i32>} : memref<16x1xf32, #tpu.memory_space<vmem>>, vector<16x1xf32>,
      %cst_21 = arith.constant 0.000000e+00 : f32
      %29 = vector.broadcast %cst_21 : f32 to vector<16x1xf32>
      %c0_22 = arith.constant 0 : index
      %c0_23 = arith.constant 0 : index
      %30 = vector.load %arg6[%c0_22, %c0_23] : memref<16x1xf32, #tpu.memory_space<vmem>>, vector<16x1xf32>
      tpu.vector_store %arg6[%c0_22, %c0_23], %29 {strides = array<i32>} : memref<16x1xf32, #tpu.memory_space<vmem>>, vector<16x1xf32>,
    } else {
    }
    %c0 = arith.constant 0 : index
    %c0_1 = arith.constant 0 : index
    %3 = vector.load %arg3[%c0, %c0_1] : memref<16x48xbf16, #tpu.memory_space<vmem>>, vector<16x48xbf16>
    %c0_2 = arith.constant 0 : index
    %c0_3 = arith.constant 0 : index
    %c0_4 = arith.constant 0 : index
    %4 = vector.load %arg2[%c0_2, %c0_3, %c0_4] : memref<1x48x128xbf16, #tpu.memory_space<vmem>>, vector<1x48x128xbf16>
    %5 = vector.shape_cast %4 : vector<1x48x128xbf16> to vector<48x128xbf16>
    %cst = arith.constant dense<0.000000e+00> : vector<16x128xf32>
    %6 = tpu.matmul %3, %5, %cst {dimension_numbers = #tpu.dot_dimension_numbers<[1], [0], [0], [1], [0, 0, 1, 1], [], []>} : vector<16x48xbf16>, vector<48x128xbf16>, vector<16x128xf32> -> vector<16x128xf32>
    %c0_5 = arith.constant 0 : index
    %c0_6 = arith.constant 0 : index
    %7 = vector.load %arg5[%c0_5, %c0_6] : memref<16x1xf32, #tpu.memory_space<vmem>>, vector<16x1xf32>
    %cst_7 = arith.constant dense<0.000000e+00> : vector<16xf32>
    %8 = vector.multi_reduction <add>, %6, %cst_7 [1] : vector<16x128xf32> to vector<16xf32>
    %9 = vector.shape_cast %8 : vector<16xf32> to vector<16x1xf32>
    %10 = arith.addf %7, %9 : vector<16x1xf32>
    %c0_8 = arith.constant 0 : index
    %c0_9 = arith.constant 0 : index
    %11 = vector.load %arg5[%c0_8, %c0_9] : memref<16x1xf32, #tpu.memory_space<vmem>>, vector<16x1xf32>
    tpu.vector_store %arg5[%c0_8, %c0_9], %10 {strides = array<i32>} : memref<16x1xf32, #tpu.memory_space<vmem>>, vector<16x1xf32>,
    %c0_10 = arith.constant 0 : index
    %c0_11 = arith.constant 0 : index
    %12 = vector.load %arg6[%c0_10, %c0_11] : memref<16x1xf32, #tpu.memory_space<vmem>>, vector<16x1xf32>
    %13 = arith.mulf %6, %6 : vector<16x128xf32>
    %cst_12 = arith.constant dense<0.000000e+00> : vector<16xf32>
    %14 = vector.multi_reduction <add>, %13, %cst_12 [1] : vector<16x128xf32> to vector<16xf32>
    %15 = vector.shape_cast %14 : vector<16xf32> to vector<16x1xf32>
    %16 = arith.addf %12, %15 : vector<16x1xf32>
    %c0_13 = arith.constant 0 : index
    %c0_14 = arith.constant 0 : index
    %17 = vector.load %arg6[%c0_13, %c0_14] : memref<16x1xf32, #tpu.memory_space<vmem>>, vector<16x1xf32>
    tpu.vector_store %arg6[%c0_13, %c0_14], %16 {strides = array<i32>} : memref<16x1xf32, #tpu.memory_space<vmem>>, vector<16x1xf32>,
    %c128_i32 = arith.constant 128 : i32
    %18 = arith.muli %arg1, %c128_i32 : i32
    %19 = tpu.assume_multiple %18, 128 : i32
    %c0_15 = arith.constant 0 : index
    %c0_16 = arith.constant 0 : index
    %20 = arith.index_cast %19 : i32 to index
    %21 = vector.load %arg4[%c0_15, %c0_16, %20] : memref<1x16x256xf32, #tpu.memory_space<vmem>>, vector<1x16x128xf32>
    %22 = vector.shape_cast %21 : vector<1x16x128xf32> to vector<16x128xf32>
    %23 = vector.shape_cast %6 : vector<16x128xf32> to vector<1x16x128xf32>
    tpu.vector_store %arg4[%c0_15, %c0_16, %20], %23 {strides = array<i32>} : memref<1x16x256xf32, #tpu.memory_space<vmem>>, vector<1x16x128xf32>,
    %c1_i32 = arith.constant 1 : i32
    %24 = arith.cmpi eq, %arg1, %c1_i32 : i32
    %25 = arith.extui %24 : i1 to i32
    %c0_i32_17 = arith.constant 0 : i32
    %26 = arith.cmpi ne, %25, %c0_i32_17 : i32
    scf.if %26 {
      %c0_18 = arith.constant 0 : index
      %c0_19 = arith.constant 0 : index
      %27 = vector.load %arg5[%c0_18, %c0_19] : memref<16x1xf32, #tpu.memory_space<vmem>>, vector<16x1xf32>
      %cst_20 = arith.constant 3.906250e-03 : f32
      %28 = vector.broadcast %cst_20 : f32 to vector<16x1xf32>
      %29 = arith.mulf %27, %28 : vector<16x1xf32>
      %c0_21 = arith.constant 0 : index
      %c0_22 = arith.constant 0 : index
      %30 = vector.load %arg6[%c0_21, %c0_22] : memref<16x1xf32, #tpu.memory_space<vmem>>, vector<16x1xf32>
      %cst_23 = arith.constant 3.906250e-03 : f32
      %31 = vector.broadcast %cst_23 : f32 to vector<16x1xf32>
      %32 = arith.mulf %30, %31 : vector<16x1xf32>
      %33 = arith.mulf %29, %29 : vector<16x1xf32>
      %34 = arith.subf %32, %33 : vector<16x1xf32>
      %cst_24 = arith.constant 0.000000e+00 : f32
      %35 = vector.broadcast %cst_24 : f32 to vector<16x1xf32>
      %36 = arith.maximumf %34, %35 : vector<16x1xf32>
      %cst_25 = arith.constant 9.99999974E-6 : f32
      %37 = vector.broadcast %cst_25 : f32 to vector<16x1xf32>
      %38 = arith.addf %36, %37 : vector<16x1xf32>
      %39 = math.rsqrt %38 : vector<16x1xf32>
      %c0_i32_26 = arith.constant 0 : i32
      %c2_i32 = arith.constant 2 : i32
      %40 = arith.addi %c0_i32_26, %c2_i32 : i32
      %c1_i32_27 = arith.constant 1 : i32
      scf.for %arg7 = %c0_i32_26 to %40 step %c1_i32_27  : i32 {
        %c128_i32_29 = arith.constant 128 : i32
        %41 = arith.muli %arg7, %c128_i32_29 : i32
        %42 = tpu.assume_multiple %41, 128 : i32
        %c0_30 = arith.constant 0 : index
        %c0_31 = arith.constant 0 : index
        %43 = arith.index_cast %42 : i32 to index
        %44 = vector.load %arg4[%c0_30, %c0_31, %43] : memref<1x16x256xf32, #tpu.memory_space<vmem>>, vector<1x16x128xf32>
        %45 = vector.shape_cast %44 : vector<1x16x128xf32> to vector<16x128xf32>
        %46 = vector.broadcast %29 : vector<16x1xf32> to vector<16x128xf32>
        %47 = arith.subf %45, %46 : vector<16x128xf32>
        %48 = vector.broadcast %39 : vector<16x1xf32> to vector<16x128xf32>
        %49 = arith.mulf %47, %48 : vector<16x128xf32>
        %cst_32 = arith.constant 0.000000e+00 : f32
        %50 = vector.broadcast %cst_32 : f32 to vector<16x128xf32>
        %51 = arith.maximumf %49, %50 : vector<16x128xf32>
        %c0_33 = arith.constant 0 : index
        %c0_34 = arith.constant 0 : index
        %52 = arith.index_cast %42 : i32 to index
        %53 = vector.load %arg4[%c0_33, %c0_34, %52] : memref<1x16x256xf32, #tpu.memory_space<vmem>>, vector<1x16x128xf32>
        %54 = vector.shape_cast %53 : vector<1x16x128xf32> to vector<16x128xf32>
        %55 = vector.shape_cast %51 : vector<16x128xf32> to vector<1x16x128xf32>
        tpu.vector_store %arg4[%c0_33, %c0_34, %52], %55 {strides = array<i32>} : memref<1x16x256xf32, #tpu.memory_space<vmem>>, vector<1x16x128xf32>,
      }
      %c2_i32_28 = arith.constant 2 : i32
    } else {
    }
    return
  }
  func.func @transform_0(%arg0: i32, %arg1: i32) -> (i32, i32, i32) {
    %c0_i32 = arith.constant 0 : i32
    %c0_i32_0 = arith.constant 0 : i32
    return %arg0, %c0_i32, %arg1 : i32, i32, i32
  }
  func.func @transform_1(%arg0: i32, %arg1: i32) -> (i32, i32) {
    %c0_i32 = arith.constant 0 : i32
    %c0_i32_0 = arith.constant 0 : i32
    %c0_i32_1 = arith.constant 0 : i32
    return %c0_i32, %c0_i32_0 : i32, i32
  }
  func.func @transform_2(%arg0: i32, %arg1: i32) -> (i32, i32, i32) {
    %c0_i32 = arith.constant 0 : i32
    %c0_i32_0 = arith.constant 0 : i32
    %c0_i32_1 = arith.constant 0 : i32
    return %arg0, %c0_i32, %c0_i32_0 : i32, i32, i32
  }
}

</mosaic_0001>

<bundles_post_ra>
// kernel: conv_block_pallas.1
= control target key start
LH: loop header
LB: loop body
LE: loop exit
PB: predicated region body
PF: predicated region fallthrough
CT: control target
= control target key end

     0   :  { %s683_s9 = smov 0   ;;  %s685_s10 = smov 0   ;;  %s787_s0 = inlined_call_operand.vmem [shape: bf16[2,48,256], index: 0, kind: input, shape index: {}]   ;;  %s788_s1 = inlined_call_operand.vmem [shape: bf16[16,48], index: 1, kind: input, shape index: {}]   ;;  %s789_s2 = inlined_call_operand.vmem [shape: f32[2,16,256], index: 2, kind: output, shape index: {}]  }
   0x1   :  { %s687_s11 = smov 0   ;;  %s689_s12 = smov 0  }
   0x2   :  { %s691_s13 = smov 0   ;;  %s693_s14 = smov 0  }
   0x3   :  { %s695_s15 = smov 0  }
   0x4 LB: > { %s21_s16 = sadd.s32 1, %s650_s13  ;;  %s24_s17 = sadd.s32 1, %s654_s14  ;;  %s658_s15 = sphi %s695_s15, %s12_s15   ;;  %s654_s14 = sphi %s693_s14, %s795_s14   ;;  %s650_s13 = sphi %s691_s13, %s794_s13   ;;  %s646_s12 = sphi %s689_s12, %s793_s12   ;;  %s642_s11 = sphi %s687_s11, %s792_s11   ;;  %s638_s10 = sphi %s685_s10, %s791_s10   ;;  %s634_s9 = sphi %s683_s9, %s790_s9  }
   0x5   : > { %p22_p0 = scmp.ge.s32.totalorder %s21_s16, 2  ;;  %p40_p1 = scmp.ne.s32.totalorder %s638_s10, %s634_s9 }
   0x6   : > { %p41_p2 = scmp.eq.s32.totalorder %s658_s15, 0  ;;  %s33_s21 = sadd.s32 1, %s638_s10 }
   0x7   : > { %s797_s16 = smov (%p22_p0, %s21_s16), 0  ;;  %s799_s17 = smov (!%p22_p0, %s24_s17), %s654_s14 }
   0x8   : > { %p42_p3 = por %p41_p2, %p40_p1  ;;  %p26_p4 = scmp.ge.s32.totalorder %s799_s17, 2 }
   0x9   : > { %s29_s18 = ssub.s32 %s650_s13, %s797_s16  ;;  %p486_p6 = scmp.ge.s32.totalorder %s658_s15, 4 }
   0xa   : > { %s801_s17 = smov (%p26_p4, %s799_s17), 0 }
   0xb   : > { %s28_s19 = ssub.s32 %s654_s14, %s801_s17  ;;  %116 = sbr.rel (%p486_p6) target bundleno = 29 (0x1d), region = 20 }
   0xc   : > { %s30_s20 = sor.u32 %s29_s18, %s28_s19 }
   0xd   : > { %p31_p5 = scmp.eq.s32.totalorder %s30_s20, 0 }
   0xf   : > { %s734_s22 = scalar_select %p31_p5, %s638_s10, %s33_s21  }
  0x12   : > { %119 = sbr.rel (!%p42_p3) target bundleno = 29 (0x1d), region = 24  ;;  %s121_s23 = sand.u32 (%p42_p3), 1, %s638_s10  }
  0x13   : > { %s520_s24 = smul.u32 (%p42_p3), 12, %s654_s14 }
  0x14   : > { %s519_s25 = smul.u32 (%p42_p3), 24, %s121_s23 }
  0x15   : > { %s125_s26 = sadd.s32 (%p42_p3), %s650_s13, %s520_s24 }
  0x16   : > { %s487_s27 = sshll.u32 (%p42_p3), %s125_s26, 2  ;;  %s123_s3 = scalar_lea.vmem (%p42_p3), [#allocation4], %s519_s25 }
  0x17   : > { %s127_s30 = scalar_lea.vmem (%p42_p3), %s787_s0, %s487_s27 }
  0x18   : > { %v143_v0 = vld [vmem:[%s127_s30] sm:$0xf] (%p42_p3)  ;;  %v145_v1 = vld [vmem:[%s127_s30 + $0x8] sm:$0xf] (%p42_p3)  ;;  %v147_v2 = vld [vmem:[%s127_s30 + $0x10] sm:$0xf] (%p42_p3) }
  0x19   : > { %144 = vst [vmem:[%s123_s3] sm:$0xf] %v143_v0  ;;  %146 = vst [vmem:[%s123_s3 + $0x4] sm:$0xf] %v145_v1  ;;  %v149_v3 = vld [vmem:[%s127_s30 + $0x18] sm:$0xf] }
  0x1a   : > { %148 = vst [vmem:[%s123_s3 + $0x8] sm:$0xf] %v147_v2  ;;  %v151_v4 = vld [vmem:[%s127_s30 + $0x20] sm:$0xf]  ;;  %v153_v5 = vld [vmem:[%s127_s30 + $0x28] sm:$0xf] }
  0x1b   : > { %150 = vst [vmem:[%s123_s3 + $0xc] sm:$0xf] %v149_v3  ;;  %152 = vst [vmem:[%s123_s3 + $0x10] sm:$0xf] %v151_v4 }
  0x1c   : > { %154 = vst [vmem:[%s123_s3 + $0x14] sm:$0xf] %v153_v5 }
  0x1d PF: > { %p488_p7 = scmp.ge.s32.totalorder %s658_s15, 1  ;;  %p188_p8 = scmp.lt.s32.totalorder %s658_s15, 5 }
  0x1f   : > { %p189_p9 = pnand %p488_p7, %p188_p8 }
  0x20   : > { %s195_s4 = sand.u32 (!%p189_p9), 1, %s634_s9   ;;  %p216_p10 = scmp.lt.s32.totalorder (!%p189_p9), %s646_s12, 1 }
  0x21   : > { %192 = sbr.rel (%p189_p9) target bundleno = 590 (0x24e), region = 65  ;;  %p491_p11 = scmp.ne.s32.totalorder (!%p189_p9), %s642_s11, 0 }
  0x22   : > { %s521_s5 = smul.u32 (!%p189_p9), 24, %s195_s4 }
  0x24   : > { %s197_s19 = scalar_lea.vmem (!%p189_p9), [#allocation4], %s521_s5 }
  0x28   : > { %s803_s12 = smov (!%p216_p10, %s646_s12), 1  ;;  %225 = sbr.rel (%p491_p11) target bundleno = 47 (0x2f), region = 73 }
  0x29   : > { %s504_s6 = sshll.u32 %s803_s12, 5  ;;  %vm226_vm0 = vcmask (!%p491_p11), 7168   ;;  %v664_v6 = vmov (!%p491_p11), 0.0  }
  0x2a   : > { %s751_s18 = scalar_lea.vmem %s789_s2, %s504_s6  ;;  %227 = vst.msk [vmem:[#allocation2] sm:$0xff] (!%p491_p11), %vm226_vm0, %v664_v6  ;;  %228 = vst.msk [vmem:[#allocation2 + $0x8] sm:$0xff] (!%p491_p11), %vm226_vm0, %v664_v6 }
  0x2b   : > { %229 = vst.msk [vmem:[#allocation3] sm:$0xff] (!%p491_p11), %vm226_vm0, %v664_v6  ;;  %230 = vst.msk [vmem:[#allocation3 + $0x8] sm:$0xff] (!%p491_p11), %vm226_vm0, %v664_v6 }
  0x2f PF: > { %v590_v7 = vld [vmem:[%s197_s19] sm:$0xff]   ;;  %v665_v8 = vmov 0.0   ;;  %v591_v9 = vld [vmem:[%s197_s19 + $0x8] sm:$0xff]   ;;  %vm666_vm1 = vmmov 0   ;;  %v592_v10 = vld [vmem:[%s197_s19 + $0x10] sm:$0xff]   ;;  %vm262_vm2 = vcmask 392192  }
  0x30   : > { %509 = vmatprep.subr.bf16.mxu0 %v665_v8  ;;  %515 = vmatprep.mubr.msk.bf16.mxu0 %vm666_vm1, %v665_v8  ;;  %v593_v11 = vld [vmem:[%s788_s1] sm:$0xff]   ;;  %s497_s20 = sshll.u32 %s642_s11, 7  ;;  %vm315_vm3 = vcmask 7168   ;;  %p499_p12 = scmp.ne.s32.totalorder %s642_s11, 1 }
  0x31   : > { %510 = vmatpush3.bf16.msra.mxu0 %v590_v7  ;;  %s331_s21 = sshra.s32 %s497_s20, 7  ;;  %v307_v18 = vld [vmem:[#allocation2] sm:$0xff]  ;;  %v308_v23 = vld [vmem:[#allocation2 + $0x8] sm:$0xff]  ;;  %s760_s11 = smov (!%p499_p12), 0  }
  0x32   : > { %511 = vmatprep.subr.bf16.mxu0 %v665_v8  ;;  %s498_s23 = sshll.u32 %s331_s21, 3  ;;  %v318_v20 = vld [vmem:[#allocation3] sm:$0xff]  ;;  %v319_v26 = vld [vmem:[#allocation3 + $0x8] sm:$0xff] }
  0x33   : > { %s334_s24 = scalar_lea.vmem %s751_s18, %s498_s23 }
  0x35   : > { %512 = vmatpush3.bf16.msra.mxu0 %v591_v9 }
  0x36   : > { %513 = vmatprep.subr.bf16.mxu0 %v665_v8 }
  0x39   : > { %514 = vmatpush3.bf16.msra.mxu0 %v592_v10 }
  0x3c   : > { %516 = vmatmul.mubr.msk.bf16.vlgmr.msra.gmra.mrb[0].mxu0 %vm262_vm2, %v593_v11 }
 0x10f   : > { %v300_v12 = vpop.f32.mrb[0].mxu0 }
 0x110   : > { %335 = vst [vmem:[%s334_s24] sm:$0xff] %v300_v12  ;;  %309 = vadd.xlane.f32.xlu0 %v300_v12  ;;  %v517_v13 = vpop.f32.mrb[1].mxu0  ;;  %v320_v14 = vmul.f32 %v300_v12, %v300_v12 }
 0x111   : > { %v303_v15 = vpop.f32.mrb[2].mxu0 }
 0x112   : > { %336 = vst [vmem:[%s334_s24 + $0x10] sm:$0xff] %v303_v15  ;;  %322 = vadd.xlane.f32.xlu1 %v320_v14  ;;  %v518_v16 = vpop.f32.mrb[3].mxu0  ;;  %v321_v17 = vmul.f32 %v303_v15, %v303_v15 }
 0x114   : > { %311 = vadd.xlane.f32.xlu0 %v303_v15 }
 0x116   : > { %324 = vadd.xlane.f32.xlu1 %v321_v17 }
 0x19d   : > { %v310_v19 = vpop.xlane.xlu0 %309 }
 0x19e   : > { %v313_v21 = vadd.f32 %v310_v19, %v307_v18 }
 0x19f   : > { %v323_v22 = vpop.xlane.xlu1 %322 }
 0x1a0   : > { %316 = vst.msk [vmem:[#allocation2] sm:$0xff] %vm315_vm3, %v313_v21  ;;  %v326_v24 = vadd.f32 %v323_v22, %v318_v20  ;;  %340 = sbr.rel (%p499_p12) target bundleno = 590 (0x24e), region = 77 }
 0x1a1   : > { %v312_v25 = vpop.xlane.xlu0 %311 }
 0x1a2   : > { %328 = vst.msk [vmem:[#allocation3] sm:$0xff] %vm315_vm3, %v326_v24  ;;  %v314_v27 = vadd.f32 %v312_v25, %v308_v23 }
 0x1a3   : > { %v325_v28 = vpop.xlane.xlu1 %324 }
 0x1a4   : > { %317 = vst.msk [vmem:[#allocation2 + $0x8] sm:$0xff] %vm315_vm3, %v314_v27  ;;  %v327_v29 = vadd.f32 %v325_v28, %v319_v26 }
 0x1a6   : > { %329 = vst.msk [vmem:[#allocation3 + $0x8] sm:$0xff] %vm315_vm3, %v327_v29 }
 0x1a7   : > { %v341_v30 = vld [vmem:[#allocation2] sm:$0xff] }
 0x1a8   : > { %v343_v33 = vmul.f32 0.00390625, %v341_v30 }
 0x1a9   : > { %v345_v32 = vld [vmem:[#allocation3] sm:$0xff] }
 0x1aa   : > { %v347_v36 = vmul.f32 0.00390625, %v345_v32  ;;  %v349_v38 = vmul.f32 %v343_v33, %v343_v33 }
 0x1ab   : > { %v342_v31 = vld [vmem:[#allocation2 + $0x8] sm:$0xff] }
 0x1ac   : > { %v344_v34 = vmul.f32 0.00390625, %v342_v31  ;;  %v351_v40 = vsub.f32 %v347_v36, %v349_v38 }
 0x1ad   : > { %v346_v35 = vld [vmem:[#allocation3 + $0x8] sm:$0xff] }
 0x1ae   : > { %v348_v37 = vmul.f32 0.00390625, %v346_v35  ;;  %v350_v39 = vmul.f32 %v344_v34, %v344_v34  ;;  %v353_v42 = vmax.f32 %v351_v40, 0.0 }
 0x1b0   : > { %v352_v41 = vsub.f32 %v348_v37, %v350_v39  ;;  %v355_v44 = vadd.f32 1e-05, %v353_v42 }
 0x1b2   : > { %v354_v43 = vmax.f32 %v352_v41, 0.0  ;;  %594 = vrsqrt.f32 %v355_v44 }
 0x1b4   : > { %v356_v45 = vadd.f32 1e-05, %v354_v43 }
 0x1b6   : > { %596 = vrsqrt.f32 %v356_v45 }
 0x1bc   : > { %v595_v46 = vpop.eup %594 }
 0x1c0   : > { %v597_v47 = vpop.eup %596 }
 0x1c1 LB: >> { %v667_v48 = vmov 0   ;;  %s500_s25 = sshll.u32 %s662_s11, 7  ;;  %s364_s11 = sadd.s32 1, %s662_s11   ;;  %s662_s11 = sphi %s760_s11, %s364_s11  }
 0x1c2   : >> { %599 = vset.pattern.permute.xlu1 %v667_v48  ;;  %598 = vset.pattern.permute.xlu0 %v667_v48  ;;  %s366_s26 = sshra.s32 %s500_s25, 7  ;;  %p361_p13 = scmp.ge.s32.totalorder %s364_s11, 2  }
 0x1c3   : >> { %386 = vperm.xlu1 %599, %v595_v46   ;;  %374 = vperm.xlu0 %598, %v343_v33   ;;  %s501_s27 = sshll.u32 %s366_s26, 3 }
 0x1c4   : >> { %s369_s28 = scalar_lea.vmem %s751_s18, %s501_s27 }
 0x1c5   : >> { %v370_v49 = vld [vmem:[%s369_s28] sm:$0xff]  ;;  %v371_v53 = vld [vmem:[%s369_s28 + $0x10] sm:$0xff] }
 0x1c7   : >> { %391 = vperm.xlu1 %599, %v597_v47   ;;  %379 = vperm.xlu0 %598, %v344_v34  }
 0x242   : >> { %v387_v50 = vpop.permute.xlu1 %386  ;;  %v375_v51 = vpop.permute.xlu0 %374 }
 0x243   : >> { %v382_v52 = vsub.f32 %v370_v49, %v375_v51 }
 0x245   : >> { %v394_v54 = vmul.f32 %v387_v50, %v382_v52 }
 0x246   : >> { %v380_v55 = vpop.permute.xlu0 %379  ;;  %v392_v58 = vpop.permute.xlu1 %391 }
 0x247   : >> { %v396_v56 = vmax.f32 %v394_v54, 0.0  ;;  %v383_v57 = vsub.f32 %v371_v53, %v380_v55  ;;  %363 = sbr.rel (!%p361_p13) target bundleno = 449 (0x1c1), region = 121 }
 0x249   : >> { %398 = vst [vmem:[%s369_s28] sm:$0xff] %v396_v56  ;;  %v395_v59 = vmul.f32 %v392_v58, %v383_v57 }
 0x24b   : >> { %v397_v60 = vmax.f32 %v395_v59, 0.0 }
 0x24d   : >> { %399 = vst [vmem:[%s369_s28 + $0x10] sm:$0xff] %v397_v60 }
 0x24e PF: > { %s12_s15 = sadd.s32 1, %s658_s15   ;;  %s790_s9 = smov %s638_s10 }
 0x24f   : > { %p9_p0 = scmp.ge.s32.totalorder %s12_s15, 6   ;;  %s791_s10 = smov %s734_s22 }
 0x250   : > { %s792_s11 = smov %s650_s13  ;;  %s793_s12 = smov %s654_s14 }
 0x251   : > { %s794_s13 = smov %s797_s16  ;;  %s795_s14 = smov %s801_s17 }
 0x252   :  { %11 = sbr.rel (!%p9_p0) target bundleno = 4 (0x4), region = 132 }

</bundles_post_ra>
